<compile_context>
chip_gen: v6e
topology: v6e:2x2x1
jax: 0.10.0
libtpu: 0.0.40
codegen_flags: <defaults>
</compile_context>

<pallas_src>
import functools

import jax
import jax.numpy as jnp
import numpy as np
from jax.experimental import pallas as pl
from jax.experimental.pallas import tpu as pltpu


def _round_up(x: int, m: int) -> int:
    return ((x + m - 1) // m) * m


def _cdiv(a: int, b: int) -> int:
    return -(-a // b)


def _device_caps():
    """Returns (diff-block byte cap, vmem_limit_bytes) per TPU generation."""
    kind = ""
    try:
        kind = jax.devices()[0].device_kind.lower()
    except Exception:  # defensive: never fail tile selection on a device query
        pass
    if "v7" in kind:                                  # 64 MiB VMEM per TensorCore
        return 4 * 1024 * 1024, 32 * 1024 * 1024
    return 8 * 1024 * 1024, 64 * 1024 * 1024          # v5e / v6e: 128 MiB VMEM


def _pick_row_tile(n: int, d: int, itemsize: int, diff_cap_bytes: int) -> int:
    row_tile = min(256, _round_up(n, 8))
    row_tile = max(8, (row_tile // 8) * 8)
    # Keep the (double-buffered) diff DMA block under the per-generation cap.
    while row_tile > 8 and row_tile * d * itemsize > diff_cap_bytes:
        row_tile = max(8, ((row_tile // 2) // 8) * 8)
    # Ensure >= 2 row blocks when possible so the "parallel" j axis shards over
    # both v7x TensorCores (harmless elsewhere: one extra ~0.35us grid step).
    while row_tile > 8 and _round_up(n, row_tile) // row_tile < 2:
        row_tile = max(8, ((row_tile // 2) // 8) * 8)
    return row_tile


def _make_hinge_kernel(min_val: float, max_val: float, lane_tile: int):
    def kernel(diff_ref, label_ref, out_ref, norm_sc):
        i = pl.program_id(1)   # label lane-chunk index (innermost grid axis)

        # Row-block L2 norms: computed once per row block (at i == 0) into VMEM
        # scratch and reused for every label chunk.  The diff block index does
        # not depend on i, so it is DMA'd only once per row block.
        # NOTE: this reuse requires i to be the innermost, sequentially
        # iterated ("arbitrary") grid axis; do not reorder the grid.
        @pl.when(i == 0)
        def _():
            x = diff_ref[...].astype(jnp.float32)                 # (row_tile, D)
            norm_sc[...] = jnp.sqrt(jnp.sum(x * x, axis=1, keepdims=True))

        # Tile of the (N, N) broadcast product (transposed layout; the mean is
        # permutation-invariant).  No padding mask here: padded rows/lanes each
        # contribute exactly clip(0), subtracted analytically on the host.
        prod = norm_sc[...] * label_ref[...]                      # (row_tile, lane_tile)
        clamped = jnp.clip(prod, min_val, max_val)

        # Sublane-only (VPU) reduction -> lane-dense (1, 1, lane_tile) store.
        # TODO(synk): optionally offload this reduce to the idle MXU via
        # jnp.dot(ones((1, row_tile)), clamped) after a bundle-dump check.
        out_ref[...] = jnp.sum(clamped, axis=0, keepdims=True).reshape(
            1, 1, lane_tile)

    return kernel


def _norm_kernel(diff_ref, out_ref):
    # O(N*D) fast-path stage: per-row L2 norms only.
    x = diff_ref[...].astype(jnp.float32)
    out_ref[...] = jnp.sqrt(jnp.sum(x * x, axis=1, keepdims=True))


@functools.partial(jax.jit,
                   static_argnames=("min_val", "max_val", "labels_are_signs"))
def hinge_loss_pallas(difference: jax.Array, label: jax.Array, *,
                      min_val: float, max_val: float,
                      labels_are_signs: bool = False) -> jax.Array:
    """difference: (N, D); label: (N, 1). Returns scalar f32 loss.

    labels_are_signs=True enables an O(N*D) fast path valid only when every
    label is exactly +1 or -1; the default path reproduces the PyTorch module
    for arbitrary label values.
    """
    N, D = difference.shape
    assert label.shape == (N, 1)

    diff_cap, vmem_limit = _device_caps()
    itemsize = jnp.dtype(difference.dtype).itemsize
    row_tile = _pick_row_tile(N, D, itemsize, diff_cap)
    n_rows_pad = _round_up(N, row_tile)
    num_j = n_rows_pad // row_tile

    # Pad rows only if actually ragged (zero rows -> norm 0 -> clip(0), handled
    # by the analytic correction / slicing).  The feature axis is never padded:
    # a full-D block is exempt from the 128-lane rule.
    diff_in = difference
    if n_rows_pad != N:
        diff_in = jnp.pad(difference, ((0, n_rows_pad - N), (0, 0)))

    inv_count = np.float32(1.0 / (float(N) * float(N)))

    if labels_are_signs:
        # sum_{i,j} clip(norm_j * label_i) = n_pos * sum_j clip(norm_j)
        #                                  + n_neg * sum_j clip(-norm_j)
        # (Output is only N floats, so the lane-sparse (row_tile, 1) store is
        # negligible traffic.)
        norms = pl.pallas_call(
            _norm_kernel,
            out_shape=jax.ShapeDtypeStruct((n_rows_pad, 1), jnp.float32),
            grid_spec=pltpu.PrefetchScalarGridSpec(
                num_scalar_prefetch=0,
                grid=(num_j,),
                in_specs=[pl.BlockSpec((row_tile, D), lambda j: (j, 0))],
                out_specs=pl.BlockSpec((row_tile, 1), lambda j: (j, 0)),
            ),
            compiler_params=pltpu.CompilerParams(
                dimension_semantics=("parallel",),
                vmem_limit_bytes=vmem_limit,
            ),
        )(diff_in)[:N, 0]

        lab = label.reshape(-1)
        n_pos = jnp.sum((lab > 0).astype(jnp.float32))
        n_neg = jnp.float32(N) - n_pos
        sum_pos = jnp.sum(jnp.clip(norms, min_val, max_val))
        sum_neg = jnp.sum(jnp.clip(-norms, min_val, max_val))
        return (n_pos * sum_pos + n_neg * sum_neg) * inv_count

    # ---------------- general path: tiled (N, N) broadcast ----------------
    n_lane_full = _round_up(N, 128)
    num_i = _cdiv(n_lane_full, 2048)                 # lane_tile <= 2048
    lane_tile = _round_up(_cdiv(n_lane_full, num_i), 128)
    n_lane_pad = lane_tile * num_i

    label_row = label.reshape(1, N).astype(jnp.float32)
    if n_lane_pad != N:
        label_row = jnp.pad(label_row, ((0, 0), (0, n_lane_pad - N)))

    partials = pl.pallas_call(
        _make_hinge_kernel(float(min_val), float(max_val), lane_tile),
        out_shape=jax.ShapeDtypeStruct((num_j, 1, n_lane_pad), jnp.float32),
        grid_spec=pltpu.PrefetchScalarGridSpec(
            num_scalar_prefetch=0,
            grid=(num_j, num_i),
            in_specs=[
                # diff block index does not depend on i -> DMA'd once per row block
                pl.BlockSpec((row_tile, D), lambda j, i: (j, 0)),
                pl.BlockSpec((1, lane_tile), lambda j, i: (0, i)),
            ],
            out_specs=pl.BlockSpec((1, 1, lane_tile), lambda j, i: (j, 0, i)),
            scratch_shapes=[pltpu.VMEM((row_tile, 1), jnp.float32)],  # row norms
        ),
        compiler_params=pltpu.CompilerParams(
            # j: independent row blocks (megacore-shardable).  i: must stay the
            # sequential innermost axis so the norm scratch filled at i==0 is valid.
            dimension_semantics=("parallel", "arbitrary"),
            vmem_limit_bytes=vmem_limit,
        ),
    )(diff_in, label_row)

    # Analytic padding correction: every padded cell contributes exactly clip(0).
    clip0 = float(np.clip(0.0, float(min_val), float(max_val)))
    pad_cells = float(n_rows_pad) * float(n_lane_pad) - float(N) * float(N)
    total = jnp.sum(partials) - np.float32(clip0 * pad_cells)
    return total * inv_count


def _reference(difference, label, min_val, max_val):
    # Pure-JAX replica of the exact torch broadcast: (N,) * (N,1) -> (N,N)
    norm = jnp.sqrt(jnp.sum(difference.astype(jnp.float32) ** 2, axis=1))  # (N,)
    prod = norm[None, :] * label.astype(jnp.float32)                       # (N, N)
    return jnp.mean(jnp.clip(prod, min_val, max_val))


if __name__ == "__main__":
    key = jax.random.PRNGKey(0)
    k1, k2, k3, k4 = jax.random.split(key, 4)

    # Asymmetric clamp window: clip(0) != 0, exercising the analytic correction.
    min_val, max_val = 0.25, 2.0

    # Case 1: tiny, fully aligned (no padding anywhere).
    N1, D1 = 8, 32
    diff1 = jax.random.normal(k1, (N1, D1), dtype=jnp.float32)
    lab1 = jnp.where(jax.random.bernoulli(k2, 0.5, (N1, 1)), 1.0, -1.0).astype(
        jnp.float32)
    out1 = jax.block_until_ready(
        hinge_loss_pallas(diff1, lab1, min_val=min_val, max_val=max_val))
    ref1 = _reference(diff1, lab1, min_val, max_val)
    np.testing.assert_allclose(np.asarray(out1), np.asarray(ref1),
                               rtol=1e-5, atol=1e-6)

    # Case 2: ragged N, non-128 D -> multiple row blocks, full-D block (no column
    # pad), row padding + analytic clip(0) correction.
    N2, D2 = 40, 96
    diff2 = jax.random.normal(k3, (N2, D2), dtype=jnp.float32)
    lab2 = jnp.where(jax.random.bernoulli(k4, 0.5, (N2, 1)), 1.0, -1.0).astype(
        jnp.float32)
    out2 = jax.block_until_ready(
        hinge_loss_pallas(diff2, lab2, min_val=min_val, max_val=max_val))
    ref2 = _reference(diff2, lab2, min_val, max_val)
    np.testing.assert_allclose(np.asarray(out2), np.asarray(ref2),
                               rtol=1e-5, atol=1e-6)

    # Case 3: opt-in +/-1 fast path (O(N*D), no quadratic stage).
    out_fast = jax.block_until_ready(
        hinge_loss_pallas(diff2, lab2, min_val=min_val, max_val=max_val,
                          labels_are_signs=True))
    np.testing.assert_allclose(np.asarray(out_fast), np.asarray(ref2),
                               rtol=1e-5, atol=1e-6)

    print("KERNEL_OK")
</pallas_src>

<mosaic_0001>
module attributes {stable_mosaic.version = 11 : i64} {
  func.func @kernel(%arg0: i32, %arg1: i32, %arg2: memref<8x32xf32, #tpu.memory_space<vmem>>, %arg3: memref<1x128xf32, #tpu.memory_space<vmem>>, %arg4: memref<1x1x128xf32, #tpu.memory_space<vmem>>, %arg5: memref<8x1xf32, #tpu.memory_space<vmem>>) attributes {dimension_semantics = [#tpu.dimension_semantics<parallel>, #tpu.dimension_semantics<arbitrary>], iteration_bounds = array<i64: 1, 1>, scalar_prefetch = 0 : i64, scratch_operands = 1 : i64, tpu.core_type = #tpu.core_type<tc>, window_params = [{transform_indices = @transform_0, window_bounds = array<i64: 8, 32>}, {transform_indices = @transform_1, window_bounds = array<i64: 1, 128>}, {transform_indices = @transform_2, window_bounds = array<i64: 1, 1, 128>}]} {
    %c0_i32 = arith.constant 0 : i32
    %0 = arith.cmpi eq, %arg1, %c0_i32 : i32
    %1 = arith.extui %0 : i1 to i32
    %c0_i32_0 = arith.constant 0 : i32
    %2 = arith.cmpi ne, %1, %c0_i32_0 : i32
    scf.if %2 {
      %c0_9 = arith.constant 0 : index
      %c0_10 = arith.constant 0 : index
      %16 = vector.load %arg2[%c0_9, %c0_10] : memref<8x32xf32, #tpu.memory_space<vmem>>, vector<8x32xf32>
      %17 = arith.mulf %16, %16 : vector<8x32xf32>
      %cst_11 = arith.constant dense<0.000000e+00> : vector<8xf32>
      %18 = vector.multi_reduction <add>, %17, %cst_11 [1] : vector<8x32xf32> to vector<8xf32>
      %19 = vector.shape_cast %18 : vector<8xf32> to vector<8x1xf32>
      %20 = math.sqrt %19 : vector<8x1xf32>
      %c0_12 = arith.constant 0 : index
      %c0_13 = arith.constant 0 : index
      %21 = vector.load %arg5[%c0_12, %c0_13] : memref<8x1xf32, #tpu.memory_space<vmem>>, vector<8x1xf32>
      tpu.vector_store %arg5[%c0_12, %c0_13], %20 {strides = array<i32>} : memref<8x1xf32, #tpu.memory_space<vmem>>, vector<8x1xf32>,
    } else {
    }
    %c0 = arith.constant 0 : index
    %c0_1 = arith.constant 0 : index
    %3 = vector.load %arg5[%c0, %c0_1] : memref<8x1xf32, #tpu.memory_space<vmem>>, vector<8x1xf32>
    %c0_2 = arith.constant 0 : index
    %c0_3 = arith.constant 0 : index
    %4 = vector.load %arg3[%c0_2, %c0_3] : memref<1x128xf32, #tpu.memory_space<vmem>>, vector<1x128xf32>
    %5 = vector.broadcast %3 : vector<8x1xf32> to vector<8x128xf32>
    %6 = vector.broadcast %4 : vector<1x128xf32> to vector<8x128xf32>
    %7 = arith.mulf %5, %6 : vector<8x128xf32>
    %cst = arith.constant 2.500000e-01 : f32
    %cst_4 = arith.constant 2.000000e+00 : f32
    %8 = vector.broadcast %cst : f32 to vector<8x128xf32>
    %9 = arith.maximumf %8, %7 : vector<8x128xf32>
    %10 = vector.broadcast %cst_4 : f32 to vector<8x128xf32>
    %11 = arith.minimumf %10, %9 : vector<8x128xf32>
    %cst_5 = arith.constant dense<0.000000e+00> : vector<128xf32>
    %12 = vector.multi_reduction <add>, %11, %cst_5 [0] : vector<8x128xf32> to vector<128xf32>
    %13 = vector.shape_cast %12 : vector<128xf32> to vector<1x128xf32>
    %14 = vector.shape_cast %13 : vector<1x128xf32> to vector<1x1x128xf32>
    %c0_6 = arith.constant 0 : index
    %c0_7 = arith.constant 0 : index
    %c0_8 = arith.constant 0 : index
    %15 = vector.load %arg4[%c0_6, %c0_7, %c0_8] : memref<1x1x128xf32, #tpu.memory_space<vmem>>, vector<1x1x128xf32>
    tpu.vector_store %arg4[%c0_6, %c0_7, %c0_8], %14 {strides = array<i32>} : memref<1x1x128xf32, #tpu.memory_space<vmem>>, vector<1x1x128xf32>,
    return
  }
  func.func @transform_0(%arg0: i32, %arg1: i32) -> (i32, i32) {
    %c0_i32 = arith.constant 0 : i32
    %c0_i32_0 = arith.constant 0 : i32
    return %arg0, %c0_i32 : i32, i32
  }
  func.func @transform_1(%arg0: i32, %arg1: i32) -> (i32, i32) {
    %c0_i32 = arith.constant 0 : i32
    %c0_i32_0 = arith.constant 0 : i32
    return %c0_i32, %arg1 : i32, i32
  }
  func.func @transform_2(%arg0: i32, %arg1: i32) -> (i32, i32, i32) {
    %c0_i32 = arith.constant 0 : i32
    %c0_i32_0 = arith.constant 0 : i32
    return %arg0, %c0_i32, %arg1 : i32, i32, i32
  }
}

</mosaic_0001>

<bundles_post_ra>
// kernel: hinge_loss_pallas.1
= control target key start
LH: loop header
LB: loop body
LE: loop exit
PB: predicated region body
PF: predicated region fallthrough
CT: control target
= control target key end

     0   :  { %7 = vsyncpa [#allocation4], 0  ;;  %s98_s9 = smov [#allocation3]   ;;  %s124_s0 = inlined_call_operand.hbm [shape: f32[8,32], index: 0, kind: input, shape index: {}]   ;;  %s125_s1 = inlined_call_operand.vmem [shape: f32[1,128], index: 1, kind: input, shape index: {}]   ;;  %s126_s2 = inlined_call_operand.vmem [shape: f32[1,1,128], index: 2, kind: output, shape index: {}]  }
   0x1   :  { %s14_s10 = sshll.u32 %s98_s9, 4  ;;  %s15_s10 = int_to_ptr.vmem [resolvable:$true] %s14_s10 }
   0x2   :  { %s84_s11 = scalar_lea.vmem %s15_s10, 128  ;;  %p89_p1 = scmp.lt.s32.totalorder %s15_s10, %s15_s10 }
   0x3   :  { %p85_p0 = scmp.ne.s32.totalorder %s15_s10, %s84_s11  ;;  %p90_p2 = scmp.lt.s32.totalorder %s84_s11, %s84_s11 }
   0x5   :  { %p91_p3 = por %p90_p2, %p89_p1 }
   0x7   :  { %p92_p4 = pnand %p91_p3, %p85_p0 }
   0x9   :  { %95 = shalt.err (!%p92_p4)
}
   0xa   :  { %17 = dma.hbm_to_vmem [thread:$0]  %s124_s0, 128, %s15_s10, [#allocation4]  }
   0xb   :  { %96 = dma.done.wait [#allocation4], 128  }
   0xc   :  { %97 = vsyncadd [#allocation4], 4294967168  ;;  %v27_v0 = vld [vmem:[#allocation3] sm:$0xff]  ;;  %vm29_vm0 = vcmask 261120   ;;  %v99_v3 = vmov 0   ;;  %vm40_vm1 = vcmask 7168  }
   0xd   :  { %v28_v1 = vmul.f32 %v27_v0, %v27_v0  ;;  %73 = vset.pattern.permute.xlu0 %v99_v3  ;;  %v70_v11 = vld [vmem:[%s125_s1] ss:$0 sm:$0xff] }
   0xf   :  { %v30_v2 = vsel %vm29_vm0, %v28_v1, 0.0 }
  0x10   :  { %31 = vadd.xlane.f32.xlu0 %v30_v2 }
  0x99   :  { %v32_v4 = vpop.xlane.xlu0 %31 }
  0x9a   :  { %74 = vrsqrt.f32 %v32_v4  ;;  %vm35_vm2 = vcmp.eq.f32.partialorder %v32_v4, inf  ;;  %v38_v7 = vand.u32 2147483648, %v32_v4  ;;  %vm37_vm3 = vcmp.eq.f32.partialorder %v32_v4, 0.0 }
  0xa7   :  { %v75_v5 = vpop.eup %74 }
  0xa8   :  { %v34_v6 = vmul.f32 %v75_v5, %v32_v4 }
  0xaa   :  { %v36_v8 = vsel %vm35_vm2, %v32_v4, %v34_v6 }
  0xab   :  { %v39_v9 = vsel %vm37_vm3, %v38_v7, %v36_v8 }
  0xac   :  { %41 = vst.msk [vmem:[#allocation2] sm:$0xff] %vm40_vm1, %v39_v9 }
  0xb3   :  { %v42_v10 = vld [vmem:[#allocation2] sm:$0xff] }
  0xb4   :  { %46 = vperm.xlu0 %73, %v42_v10  }
 0x12f   :  { %v47_v12 = vpop.permute.xlu0 %46 }
 0x130   :  { %v55_v13 = vmul.f32 %v70_v11, %v47_v12 }
 0x132   :  { %v56_v14 = vmax.f32 %v55_v13, 0.25 }
 0x134   :  { %v57_v15 = vmin.f32 %v56_v14, 2.0 }
 0x136   :  { %v58_v16 = vrot.slane %v57_v15, 4 }
 0x138   :  { %v59_v17 = vadd.f32 %v58_v16, %v57_v15 }
 0x13a   :  { %v60_v18 = vrot.slane %v59_v17, 2 }
 0x13c   :  { %v61_v19 = vadd.f32 %v60_v18, %v59_v17 }
 0x13e   :  { %v62_v20 = vrot.slane %v61_v19, 1 }
 0x140   :  { %v63_v21 = vadd.f32 %v62_v20, %v61_v19 }
 0x142   :  { %64 = vst [vmem:[%s126_s2] sm:$0x1] %v63_v21 }
 0x143   :  { %69 = vsyncpa [#allocation4], 1 }

</bundles_post_ra>
